<compile_context>
chip_gen: v7x
topology: tpu7x:2x2x1
jax: 0.10.0
libtpu: 0.0.40
codegen_flags: <defaults>
</compile_context>

<pallas_src>
import jax
import jax.numpy as jnp
from jax.experimental import pallas as pl
from jax.experimental.pallas import tpu as pltpu

_VMEM = pltpu.MemorySpace.VMEM


def _round_up(v, m):
    return ((v + m - 1) // m) * m


def _hgnn_reduce_kernel(h_ref, x_ref, w_ref, mw_ref, de_inv_ref, m_acc, de_acc):
    """Pass 1 (sequential reduction over node tiles).

    Accumulates M = sum_tiles H_t^T @ (Dn_t x_t) and the edge degrees; at the last
    tile finalizes MW = M @ W (reassociated Linear) and de_inv = 1/de (guarded).
    """
    i = pl.program_id(0)

    @pl.when(i == 0)
    def _init():
        m_acc[...] = jnp.zeros_like(m_acc)
        de_acc[...] = jnp.zeros_like(de_acc)

    h = h_ref[...].astype(jnp.float32)          # [TN, Ep]  (0/1 values, exact from bf16)
    x = x_ref[...]                              # [TN, Dp]  f32

    # Node degrees of this tile: Dn = deg^-0.5, non-finite -> 0 (isolated nodes).
    dn = jnp.sum(h, axis=1, keepdims=True)      # [TN, 1]
    dn_inv = jax.lax.rsqrt(dn)
    dn_inv = jnp.where(jnp.isfinite(dn_inv), dn_inv, 0.0)
    x1 = dn_inv * x                             # Dn @ x  (this tile)

    # H_t^T @ x1: contract the node axis directly — no transposed copy of H needed.
    m_acc[...] += jax.lax.dot_general(
        h, x1,
        dimension_numbers=(((0,), (0,)), ((), ())),
        preferred_element_type=jnp.float32)     # [Ep, Dp]

    # Edge degrees (column sums of H), accumulated across node tiles.
    de_acc[...] += jnp.sum(h, axis=0, keepdims=True)   # [1, Ep]

    @pl.when(i == pl.num_programs(0) - 1)
    def _finalize():
        # Reassociated Linear: De @ M @ W == De @ (M @ W); W hits the small [Ep, Dp]
        # intermediate so the big second H matmul runs at width Dout.
        mw_ref[...] = jnp.dot(m_acc[...], w_ref[...],
                              preferred_element_type=jnp.float32)   # [Ep, DoutP]
        de_inv = pl.reciprocal(de_acc[...], approx=False)
        de_inv_ref[...] = jnp.where(jnp.isfinite(de_inv), de_inv, 0.0)


def _hgnn_output_kernel(h_ref, mw_ref, de_inv_ref, b_ref, o_ref):
    """Pass 2 (parallel over node tiles): out = Dn @ (H * de_inv) @ (M W) + b."""
    h = h_ref[...].astype(jnp.float32)          # [TN, Ep]
    dn = jnp.sum(h, axis=1, keepdims=True)      # [TN, 1]
    dn_inv = jax.lax.rsqrt(dn)
    dn_inv = jnp.where(jnp.isfinite(dn_inv), dn_inv, 0.0)

    hs = h * de_inv_ref[...]                    # De applied as a lane-broadcast column scale
    y = jnp.dot(hs, mw_ref[...], preferred_element_type=jnp.float32)   # [TN, DoutP]
    o_ref[...] = (dn_inv * y + b_ref[...]).astype(o_ref.dtype)


def hgnn_layer(x, H, W, b, *, tile_n=256):
    """x: [N, Din] f32, H: [N, E] incidence, W: [Dout, Din] (PyTorch layout), b: [Dout]."""
    N, Din = x.shape
    _, E = H.shape
    Dout = W.shape[0]

    # Lane-dense padding (zero padding is exact for this math) and node tiling.
    Ep = _round_up(E, 128)
    Dp = _round_up(Din, 128)
    DoutP = _round_up(Dout, 128)
    TN = min(tile_n, _round_up(N, 8))
    Np = _round_up(N, TN)
    T = Np // TN

    Hp = jnp.zeros((Np, Ep), jnp.bfloat16).at[:N, :E].set(H.astype(jnp.bfloat16))
    xp = jnp.zeros((Np, Dp), jnp.float32).at[:N, :Din].set(x.astype(jnp.float32))
    Wp = jnp.zeros((Dp, DoutP), jnp.float32).at[:Din, :Dout].set(W.T.astype(jnp.float32))
    bp = jnp.zeros((1, DoutP), jnp.float32).at[0, :Dout].set(b.astype(jnp.float32))

    h_bytes = Np * Ep * 2   # bf16 incidence matrix

    # --- pass 1: reduction over node tiles -> MW [Ep, DoutP], de_inv [1, Ep] ---
    mw, de_inv = pl.pallas_call(
        _hgnn_reduce_kernel,
        out_shape=(jax.ShapeDtypeStruct((Ep, DoutP), jnp.float32),
                   jax.ShapeDtypeStruct((1, Ep), jnp.float32)),
        grid_spec=pltpu.PrefetchScalarGridSpec(
            num_scalar_prefetch=0,
            grid=(T,),
            in_specs=[
                pl.BlockSpec((TN, Ep), lambda i: (i, 0), memory_space=_VMEM),
                pl.BlockSpec((TN, Dp), lambda i: (i, 0), memory_space=_VMEM),
                pl.BlockSpec((Dp, DoutP), lambda i: (0, 0), memory_space=_VMEM),
            ],
            out_specs=(
                pl.BlockSpec((Ep, DoutP), lambda i: (0, 0), memory_space=_VMEM),
                pl.BlockSpec((1, Ep), lambda i: (0, 0), memory_space=_VMEM),
            ),
            scratch_shapes=[
                pltpu.VMEM((Ep, Dp), jnp.float32),
                pltpu.VMEM((1, Ep), jnp.float32),
            ],
        ),
        compiler_params=pltpu.CompilerParams(
            dimension_semantics=("arbitrary",),
            vmem_limit_bytes=64 * 1024 * 1024,
        ),
        cost_estimate=pl.CostEstimate(
            flops=2 * Np * Ep * Dp + 2 * Ep * Dp * DoutP,
            transcendentals=Np + Ep,
            bytes_accessed=h_bytes + Np * Dp * 4 + Dp * DoutP * 4
                           + Ep * DoutP * 4 + Ep * 4,
        ),
    )(Hp, xp, Wp)

    # --- pass 2: parallel over node tiles -> out [Np, DoutP] ---
    out_p = pl.pallas_call(
        _hgnn_output_kernel,
        out_shape=jax.ShapeDtypeStruct((Np, DoutP), jnp.float32),
        grid_spec=pltpu.PrefetchScalarGridSpec(
            num_scalar_prefetch=0,
            grid=(T,),
            in_specs=[
                pl.BlockSpec((TN, Ep), lambda i: (i, 0), memory_space=_VMEM),
                pl.BlockSpec((Ep, DoutP), lambda i: (0, 0), memory_space=_VMEM),
                pl.BlockSpec((1, Ep), lambda i: (0, 0), memory_space=_VMEM),
                pl.BlockSpec((1, DoutP), lambda i: (0, 0), memory_space=_VMEM),
            ],
            out_specs=pl.BlockSpec((TN, DoutP), lambda i: (i, 0), memory_space=_VMEM),
        ),
        compiler_params=pltpu.CompilerParams(
            dimension_semantics=("parallel",),
            vmem_limit_bytes=64 * 1024 * 1024,
        ),
        cost_estimate=pl.CostEstimate(
            flops=2 * Np * Ep * DoutP,
            transcendentals=Np,
            bytes_accessed=h_bytes + Ep * DoutP * 4 + Ep * 4 + DoutP * 4
                           + Np * DoutP * 4,
        ),
    )(Hp, mw, de_inv, bp)

    return out_p[:N, :Dout]


def hgnn_layer_ref(x, H, W, b):
    """Pure-JAX reference mirroring the PyTorch forward exactly."""
    dn = jnp.sum(H, axis=-1)
    de = jnp.sum(H, axis=0)
    dn_inv = jnp.power(dn, -0.5)
    dn_inv = jnp.where(jnp.isfinite(dn_inv), dn_inv, 0.0)
    de_inv = jnp.power(de, -1.0)
    de_inv = jnp.where(jnp.isfinite(de_inv), de_inv, 0.0)
    y = dn_inv[:, None] * x
    y = H.T @ y
    y = de_inv[:, None] * y
    y = H @ y
    y = dn_inv[:, None] * y
    return y @ W.T + b


if __name__ == "__main__":
    # Small, module-consistent shapes.
    num_nodes = 64
    num_edges = 32
    input_dim = 32
    output_dim = 16

    key = jax.random.PRNGKey(0)
    kx, kh, kw, kb = jax.random.split(key, 4)

    x = jax.random.normal(kx, (num_nodes, input_dim), dtype=jnp.float32)
    # Binary incidence matrix (some nodes / edges may be isolated -> exercises
    # the nan_to_num path).
    H = (jax.random.uniform(kh, (num_nodes, num_edges)) < 0.25).astype(jnp.float32)

    # Deterministic Linear params, PyTorch-style uniform(-1/sqrt(in), 1/sqrt(in)).
    bound = 1.0 / (input_dim ** 0.5)
    W = jax.random.uniform(kw, (output_dim, input_dim), minval=-bound, maxval=bound,
                           dtype=jnp.float32)
    b = jax.random.uniform(kb, (output_dim,), minval=-bound, maxval=bound,
                           dtype=jnp.float32)

    out = hgnn_layer(x, H, W, b)
    out = jax.block_until_ready(out)

    ref = hgnn_layer_ref(x, H, W, b)
    assert out.shape == (num_nodes, output_dim)
    assert jnp.allclose(out, ref, atol=1e-4, rtol=1e-4), "mismatch vs JAX reference"

    print("KERNEL_OK")
</pallas_src>

<mosaic_0001>
module attributes {stable_mosaic.version = 11 : i64} {
  func.func @_hgnn_reduce_kernel(%arg0: i32, %arg1: memref<64x128xbf16, #tpu.memory_space<vmem>>, %arg2: memref<64x128xf32, #tpu.memory_space<vmem>>, %arg3: memref<128x128xf32, #tpu.memory_space<vmem>>, %arg4: memref<128x128xf32, #tpu.memory_space<vmem>>, %arg5: memref<1x128xf32, #tpu.memory_space<vmem>>, %arg6: memref<128x128xf32, #tpu.memory_space<vmem>>, %arg7: memref<1x128xf32, #tpu.memory_space<vmem>>) attributes {dimension_semantics = [#tpu.dimension_semantics<arbitrary>], iteration_bounds = array<i64: 1>, scalar_prefetch = 0 : i64, scratch_operands = 2 : i64, tpu.core_type = #tpu.core_type<tc>, window_params = [{transform_indices = @transform_0, window_bounds = array<i64: 64, 128>}, {transform_indices = @transform_1, window_bounds = array<i64: 64, 128>}, {pipeline_mode = #tpu.pipeline_mode<synchronous>, transform_indices = @transform_2, window_bounds = array<i64: 128, 128>}, {pipeline_mode = #tpu.pipeline_mode<synchronous>, transform_indices = @transform_3, window_bounds = array<i64: 128, 128>}, {pipeline_mode = #tpu.pipeline_mode<synchronous>, transform_indices = @transform_4, window_bounds = array<i64: 1, 128>}]} {
    %c0_i32 = arith.constant 0 : i32
    %0 = arith.cmpi eq, %arg0, %c0_i32 : i32
    %1 = arith.extui %0 : i1 to i32
    %c0_i32_0 = arith.constant 0 : i32
    %2 = arith.cmpi ne, %1, %c0_i32_0 : i32
    scf.if %2 {
      %cst_18 = arith.constant 0.000000e+00 : f32
      %27 = vector.broadcast %cst_18 : f32 to vector<128x128xf32>
      %c0_19 = arith.constant 0 : index
      %c0_20 = arith.constant 0 : index
      %28 = vector.load %arg6[%c0_19, %c0_20] : memref<128x128xf32, #tpu.memory_space<vmem>>, vector<128x128xf32>
      tpu.vector_store %arg6[%c0_19, %c0_20], %27 {strides = array<i32>} : memref<128x128xf32, #tpu.memory_space<vmem>>, vector<128x128xf32>,
      %cst_21 = arith.constant 0.000000e+00 : f32
      %29 = vector.broadcast %cst_21 : f32 to vector<1x128xf32>
      %c0_22 = arith.constant 0 : index
      %c0_23 = arith.constant 0 : index
      %30 = vector.load %arg7[%c0_22, %c0_23] : memref<1x128xf32, #tpu.memory_space<vmem>>, vector<1x128xf32>
      tpu.vector_store %arg7[%c0_22, %c0_23], %29 {strides = array<i32>} : memref<1x128xf32, #tpu.memory_space<vmem>>, vector<1x128xf32>,
    } else {
    }
    %c0 = arith.constant 0 : index
    %c0_1 = arith.constant 0 : index
    %3 = vector.load %arg1[%c0, %c0_1] : memref<64x128xbf16, #tpu.memory_space<vmem>>, vector<64x128xbf16>
    %4 = arith.extf %3 : vector<64x128xbf16> to vector<64x128xf32>
    %c0_2 = arith.constant 0 : index
    %c0_3 = arith.constant 0 : index
    %5 = vector.load %arg2[%c0_2, %c0_3] : memref<64x128xf32, #tpu.memory_space<vmem>>, vector<64x128xf32>
    %cst = arith.constant dense<0.000000e+00> : vector<64xf32>
    %6 = vector.multi_reduction <add>, %4, %cst [1] : vector<64x128xf32> to vector<64xf32>
    %7 = vector.shape_cast %6 : vector<64xf32> to vector<64x1xf32>
    %8 = math.rsqrt %7 : vector<64x1xf32>
    %9 = tpu.weird %8 : vector<64x1xf32> -> vector<64x1xi1>
    %cst_4 = arith.constant dense<true> : vector<64x1xi1>
    %10 = arith.xori %9, %cst_4 : vector<64x1xi1>
    %cst_5 = arith.constant 0.000000e+00 : f32
    %11 = vector.broadcast %cst_5 : f32 to vector<64x1xf32>
    %12 = arith.select %10, %8, %11 : vector<64x1xi1>, vector<64x1xf32>
    %13 = vector.broadcast %12 : vector<64x1xf32> to vector<64x128xf32>
    %14 = arith.mulf %13, %5 : vector<64x128xf32>
    %c0_6 = arith.constant 0 : index
    %c0_7 = arith.constant 0 : index
    %15 = vector.load %arg6[%c0_6, %c0_7] : memref<128x128xf32, #tpu.memory_space<vmem>>, vector<128x128xf32>
    %cst_8 = arith.constant dense<0.000000e+00> : vector<128x128xf32>
    %16 = tpu.matmul %4, %14, %cst_8 {dimension_numbers = #tpu.dot_dimension_numbers<[0], [0], [1], [1], [0, 1, 1, 1], [], []>} : vector<64x128xf32>, vector<64x128xf32>, vector<128x128xf32> -> vector<128x128xf32>
    %17 = arith.addf %15, %16 : vector<128x128xf32>
    %c0_9 = arith.constant 0 : index
    %c0_10 = arith.constant 0 : index
    %18 = vector.load %arg6[%c0_9, %c0_10] : memref<128x128xf32, #tpu.memory_space<vmem>>, vector<128x128xf32>
    tpu.vector_store %arg6[%c0_9, %c0_10], %17 {strides = array<i32>} : memref<128x128xf32, #tpu.memory_space<vmem>>, vector<128x128xf32>,
    %c0_11 = arith.constant 0 : index
    %c0_12 = arith.constant 0 : index
    %19 = vector.load %arg7[%c0_11, %c0_12] : memref<1x128xf32, #tpu.memory_space<vmem>>, vector<1x128xf32>
    %cst_13 = arith.constant dense<0.000000e+00> : vector<128xf32>
    %20 = vector.multi_reduction <add>, %4, %cst_13 [0] : vector<64x128xf32> to vector<128xf32>
    %21 = vector.shape_cast %20 : vector<128xf32> to vector<1x128xf32>
    %22 = arith.addf %19, %21 : vector<1x128xf32>
    %c0_14 = arith.constant 0 : index
    %c0_15 = arith.constant 0 : index
    %23 = vector.load %arg7[%c0_14, %c0_15] : memref<1x128xf32, #tpu.memory_space<vmem>>, vector<1x128xf32>
    tpu.vector_store %arg7[%c0_14, %c0_15], %22 {strides = array<i32>} : memref<1x128xf32, #tpu.memory_space<vmem>>, vector<1x128xf32>,
    %c0_i32_16 = arith.constant 0 : i32
    %24 = arith.cmpi eq, %arg0, %c0_i32_16 : i32
    %25 = arith.extui %24 : i1 to i32
    %c0_i32_17 = arith.constant 0 : i32
    %26 = arith.cmpi ne, %25, %c0_i32_17 : i32
    scf.if %26 {
      %c0_18 = arith.constant 0 : index
      %c0_19 = arith.constant 0 : index
      %27 = vector.load %arg6[%c0_18, %c0_19] : memref<128x128xf32, #tpu.memory_space<vmem>>, vector<128x128xf32>
      %c0_20 = arith.constant 0 : index
      %c0_21 = arith.constant 0 : index
      %28 = vector.load %arg3[%c0_20, %c0_21] : memref<128x128xf32, #tpu.memory_space<vmem>>, vector<128x128xf32>
      %cst_22 = arith.constant dense<0.000000e+00> : vector<128x128xf32>
      %29 = tpu.matmul %27, %28, %cst_22 {dimension_numbers = #tpu.dot_dimension_numbers<[1], [0], [0], [1], [0, 0, 1, 1], [], []>} : vector<128x128xf32>, vector<128x128xf32>, vector<128x128xf32> -> vector<128x128xf32>
      %c0_23 = arith.constant 0 : index
      %c0_24 = arith.constant 0 : index
      %30 = vector.load %arg4[%c0_23, %c0_24] : memref<128x128xf32, #tpu.memory_space<vmem>>, vector<128x128xf32>
      tpu.vector_store %arg4[%c0_23, %c0_24], %29 {strides = array<i32>} : memref<128x128xf32, #tpu.memory_space<vmem>>, vector<128x128xf32>,
      %c0_25 = arith.constant 0 : index
      %c0_26 = arith.constant 0 : index
      %31 = vector.load %arg7[%c0_25, %c0_26] : memref<1x128xf32, #tpu.memory_space<vmem>>, vector<1x128xf32>
      %32 = tpu.reciprocal %31 : vector<1x128xf32> -> vector<1x128xf32>
      %33 = tpu.weird %32 : vector<1x128xf32> -> vector<1x128xi1>
      %cst_27 = arith.constant dense<true> : vector<1x128xi1>
      %34 = arith.xori %33, %cst_27 : vector<1x128xi1>
      %cst_28 = arith.constant 0.000000e+00 : f32
      %35 = vector.broadcast %cst_28 : f32 to vector<1x128xf32>
      %36 = arith.select %34, %32, %35 : vector<1x128xi1>, vector<1x128xf32>
      %c0_29 = arith.constant 0 : index
      %c0_30 = arith.constant 0 : index
      %37 = vector.load %arg5[%c0_29, %c0_30] : memref<1x128xf32, #tpu.memory_space<vmem>>, vector<1x128xf32>
      tpu.vector_store %arg5[%c0_29, %c0_30], %36 {strides = array<i32>} : memref<1x128xf32, #tpu.memory_space<vmem>>, vector<1x128xf32>,
    } else {
    }
    return
  }
  func.func @transform_0(%arg0: i32) -> (i32, i32) {
    %c0_i32 = arith.constant 0 : i32
    %c0_i32_0 = arith.constant 0 : i32
    return %arg0, %c0_i32 : i32, i32
  }
  func.func @transform_1(%arg0: i32) -> (i32, i32) {
    %c0_i32 = arith.constant 0 : i32
    %c0_i32_0 = arith.constant 0 : i32
    return %arg0, %c0_i32 : i32, i32
  }
  func.func @transform_2(%arg0: i32) -> (i32, i32) {
    %c0_i32 = arith.constant 0 : i32
    %c0_i32_0 = arith.constant 0 : i32
    %c0_i32_1 = arith.constant 0 : i32
    return %c0_i32, %c0_i32_0 : i32, i32
  }
  func.func @transform_3(%arg0: i32) -> (i32, i32) {
    %c0_i32 = arith.constant 0 : i32
    %c0_i32_0 = arith.constant 0 : i32
    %c0_i32_1 = arith.constant 0 : i32
    return %c0_i32, %c0_i32_0 : i32, i32
  }
  func.func @transform_4(%arg0: i32) -> (i32, i32) {
    %c0_i32 = arith.constant 0 : i32
    %c0_i32_0 = arith.constant 0 : i32
    %c0_i32_1 = arith.constant 0 : i32
    return %c0_i32, %c0_i32_0 : i32, i32
  }
}

</mosaic_0001>

<bundles_post_ra>
// kernel: tpu_custom_call.1
= control target key start
LH: loop header
LB: loop body
LE: loop exit
PB: predicated region body
PF: predicated region fallthrough
CT: control target
= control target key end

     0   :  { %10 = vsyncpa [#allocation5], 0  ;;  %s1272_s0 = inlined_call_operand.hbm [shape: bf16[64,128], index: 0, kind: input, shape index: {}]   ;;  %s1273_s1 = inlined_call_operand.hbm [shape: f32[64,128], index: 1, kind: input, shape index: {}]   ;;  %s1274_s2 = inlined_call_operand.hbm [shape: f32[128,128], index: 2, kind: input, shape index: {}]   ;;  %s1275_s3 = inlined_call_operand.hbm [shape: f32[128,128], index: 3, kind: output, shape index: {0}]   ;;  %s1276_s4 = inlined_call_operand.hbm [shape: f32[1,128], index: 4, kind: output, shape index: {1}]  }
   0x1   :  { %11 = vsyncpa [#allocation8], 0 }
   0x2   :  { %12 = vsyncpa [#allocation6], 0 }
   0x3   :  { %13 = vsyncpa [#allocation12], 0  ;;  %s1082_s15 = smov [#allocation7]   ;;  %s964_s19 = scalar_lea.hbm %s1273_s1, 1024 }
   0x4   :  { %s31_s16 = sshll.u32 %s1082_s15, 4  ;;  %p965_p0 = scmp.ne.s32.totalorder %s1273_s1, %s964_s19  ;;  %s32_s16 = int_to_ptr.vmem [resolvable:$true] %s31_s16 }
   0x5   :  { %p968_p1 = scmp.lt.u32.totalorder %s964_s19, %s1273_s1 }
   0x7   :  { %p970_p2 = pnand %p968_p1, %p965_p0 }
   0x9   :  { %973 = shalt.err (!%p970_p2)
}
   0xa   :  { %s974_s24 = scalar_lea.vmem %s32_s16, 1024  ;;  %p979_p4 = scmp.lt.s32.totalorder %s32_s16, %s32_s16 }
   0xb   :  { %p975_p3 = scmp.ne.s32.totalorder %s32_s16, %s974_s24  ;;  %p980_p5 = scmp.lt.s32.totalorder %s974_s24, %s974_s24 }
   0xd   :  { %p981_p6 = por %p980_p5, %p979_p4 }
   0xf   :  { %p982_p7 = pnand %p981_p6, %p975_p3 }
  0x11   :  { %985 = shalt.err (!%p982_p7)
}
  0x12   :  { %s1083_s25 = smov 128   ;;  %s1084_s26 = smov 8  }
  0x13   :  { %37 = dma.hbm_to_vmem [thread:$0]  %s1273_s1, 1024, %s32_s16, [#allocation8], %s1083_s25, %s1083_s25, %s1084_s26  }
  0x14   :  { %s1085_s29 = smov [#allocation4]   ;;  %s986_s7 = scalar_lea.hbm %s1272_s0, 512 }
  0x15   :  { %s19_s30 = sshll.u32 %s1085_s29, 4  ;;  %p987_p8 = scmp.ne.s32.totalorder %s1272_s0, %s986_s7  ;;  %s20_s30 = int_to_ptr.vmem [resolvable:$true] %s19_s30 }
  0x16   :  { %p990_p9 = scmp.lt.u32.totalorder %s986_s7, %s1272_s0 }
  0x18   :  { %p992_p10 = pnand %p990_p9, %p987_p8 }
  0x1a   :  { %995 = shalt.err (!%p992_p10)
}
  0x1b   :  { %s996_s12 = scalar_lea.vmem %s20_s30, 512  ;;  %p1001_p12 = scmp.lt.s32.totalorder %s20_s30, %s20_s30 }
  0x1c   :  { %p997_p11 = scmp.ne.s32.totalorder %s20_s30, %s996_s12  ;;  %p1002_p13 = scmp.lt.s32.totalorder %s996_s12, %s996_s12 }
  0x1e   :  { %p1003_p0 = por %p1002_p13, %p1001_p12 }
  0x20   :  { %p1004_p1 = pnand %p1003_p0, %p997_p11 }
  0x22   :  { %1007 = shalt.err (!%p1004_p1)
}
  0x23   :  { %s1086_s1 = smov 64   ;;  %s1087_s13 = smov 4  }
  0x24   :  { %25 = dma.hbm_to_vmem [thread:$0]  %s1272_s0, 512, %s20_s30, [#allocation5], %s1086_s1, %s1086_s1, %s1087_s13  }
  0x25   :  { %s1088_s16 = smov [#allocation9]   ;;  %s1008_s20 = scalar_lea.hbm %s1274_s2, 2048 }
  0x26   :  { %s43_s17 = sshll.u32 %s1088_s16, 4  ;;  %p1009_p2 = scmp.ne.s32.totalorder %s1274_s2, %s1008_s20  ;;  %s44_s17 = int_to_ptr.vmem [resolvable:$true] %s43_s17 }
  0x27   :  { %p1012_p3 = scmp.lt.u32.totalorder %s1008_s20, %s1274_s2 }
  0x29   :  { %p1014_p4 = pnand %p1012_p3, %p1009_p2 }
  0x2b   :  { %1017 = shalt.err (!%p1014_p4)
}
  0x2c   :  { %s1018_s27 = scalar_lea.vmem %s44_s17, 2048  ;;  %p1023_p6 = scmp.lt.s32.totalorder %s44_s17, %s44_s17 }
  0x2d   :  { %p1019_p5 = scmp.ne.s32.totalorder %s44_s17, %s1018_s27  ;;  %p1024_p7 = scmp.lt.s32.totalorder %s1018_s27, %s1018_s27 }
  0x2f   :  { %p1025_p8 = por %p1024_p7, %p1023_p6 }
  0x31   :  { %p1026_p9 = pnand %p1025_p8, %p1019_p5 }
  0x33   :  { %1029 = shalt.err (!%p1026_p9)
}
  0x34   :  { %49 = dma.hbm_to_vmem [thread:$0]  %s1274_s2, 2048, %s44_s17, [#allocation8], %s1083_s25, %s1083_s25, %s1084_s26  }
  0x35   :  { %1074 = dma.done.wait [#allocation5], 512  }
  0x36   :  { %1075 = vsyncadd [#allocation5], 4294966784 }
  0x37   :  { %1076 = dma.done.wait [#allocation8], 3072  }
  0x38   :  { %1077 = vsyncadd [#allocation8], 4294964224  ;;  %v1089_v0 = vmov 0.0   ;;  %v716_v1 = vld [vmem:[#allocation4 + $0x8] sm:$0xff]   ;;  %v701_v2 = vld [vmem:[#allocation4] sm:$0xff]   ;;  %vm1090_vm2 = vmmov 1  }
  0x39   :  { %79 = vst [vmem:[#allocation3] sm:$0x1] %v1089_v0  ;;  %v706_v3 = vunpack.c.l.bf16 %v716_v1  ;;  %v702_v4 = vunpack.c.l.bf16 %v701_v2  ;;  %v703_v5 = vunpack.c.h.bf16 %v701_v2  ;;  %v707_v6 = vunpack.c.h.bf16 %v716_v1  ;;  %v717_v8 = vld [vmem:[#allocation4 + $0x10] sm:$0xff]   ;;  %v718_v13 = vld [vmem:[#allocation4 + $0x18] sm:$0xff]   ;;  %v469_v28 = vld [vmem:[#allocation9] sm:$0xff]  ;;  %s1091_s2 = smov [#allocation11]  }
  0x3a   :  { %v711_v10 = vunpack.c.h.bf16 %v717_v8  ;;  %v710_v11 = vunpack.c.l.bf16 %v717_v8  ;;  %v715_v15 = vunpack.c.h.bf16 %v718_v13  ;;  %v714_v16 = vunpack.c.l.bf16 %v718_v13  ;;  %v470_v29 = vld [vmem:[#allocation9 + $0x8] sm:$0xff]  ;;  %v471_v30 = vld [vmem:[#allocation9 + $0x10] sm:$0xff]  ;;  %v472_v32 = vld [vmem:[#allocation9 + $0x18] sm:$0xff]  ;;  %s670_s29 = sshll.u32 %s1091_s2, 4  ;;  %s671_s29 = int_to_ptr.vmem [resolvable:$true] %s670_s29 }
  0x3b   :  { %108 = vadd.xlane.f32.xlu1 %v706_v3  ;;  %104 = vadd.xlane.f32.xlu0 %v702_v4  ;;  %v435_v7 = vadd.f32 %v703_v5, %v702_v4  ;;  %v1160_v31 = vpack.c.bf16 %v470_v29, %v469_v28  ;;  %v1162_v33 = vpack.c.bf16 %v472_v32, %v471_v30  ;;  %v473_v34 = vld [vmem:[#allocation9 + $0x20] sm:$0xff]  ;;  %v474_v35 = vld [vmem:[#allocation9 + $0x28] sm:$0xff]  ;;  %v475_v37 = vld [vmem:[#allocation9 + $0x30] sm:$0xff]  ;;  %s1030_s30 = scalar_lea.vmem %s671_s29, 16  ;;  %s1034_s5 = scalar_lea.vmem %s671_s29, 32 }
  0x3c   :  { %v1167_v36 = vpack.c.bf16 %v474_v35, %v473_v34  ;;  %v476_v38 = vld [vmem:[#allocation9 + $0x38] sm:$0xff]  ;;  %v477_v40 = vld [vmem:[#allocation9 + $0x40] sm:$0xff]  ;;  %v478_v41 = vld [vmem:[#allocation9 + $0x48] sm:$0xff]  ;;  %p1031_p10 = scmp.ne.s32.totalorder %s671_s29, %s1030_s30  ;;  %p1035_p11 = scmp.lt.s32.totalorder %s671_s29, %s671_s29 }
  0x3d   :  { %v436_v9 = vadd.f32 %v706_v3, %v435_v7  ;;  %919 = vmatprep.subr.bf16.mxu1 %v1160_v31  ;;  %v1171_v39 = vpack.c.bf16 %v476_v38, %v475_v37  ;;  %v1175_v42 = vpack.c.bf16 %v478_v41, %v477_v40  ;;  %v479_v43 = vld [vmem:[#allocation9 + $0x50] sm:$0xff]  ;;  %v480_v44 = vld [vmem:[#allocation9 + $0x58] sm:$0xff]  ;;  %v481_v46 = vld [vmem:[#allocation9 + $0x60] sm:$0xff]  ;;  %p1036_p12 = scmp.lt.s32.totalorder %s1034_s5, %s1030_s30 }
  0x3e   :  { %927 = vmatpush3.bf16.msra.mxu1 %v1160_v31  ;;  %v1179_v45 = vpack.c.bf16 %v480_v44, %v479_v43  ;;  %v482_v47 = vld [vmem:[#allocation9 + $0x68] sm:$0xff]  ;;  %v483_v51 = vld [vmem:[#allocation9 + $0x70] sm:$0xff]  ;;  %v484_v52 = vld [vmem:[#allocation9 + $0x78] sm:$0xff] }
  0x3f   :  { %110 = vadd.xlane.f32.xlu1 %v707_v6  ;;  %106 = vadd.xlane.f32.xlu0 %v703_v5  ;;  %v437_v12 = vadd.f32 %v707_v6, %v436_v9  ;;  %v1183_v50 = vpack.c.bf16 %v482_v47, %v481_v46  ;;  %v1187_v55 = vpack.c.bf16 %v484_v52, %v483_v51  ;;  %v98_v1 = vld [vmem:[#allocation7 + $0x10] sm:$0xff]  ;;  %p1037_p13 = por %p1036_p12, %p1035_p11 }
  0x40   :  { %v434_v25 = vld [vmem:[#allocation3] sm:$0x1]  ;;  %920 = vmatprep.subr.bf16.mxu1 %v1162_v33 }
  0x41   :  { %v438_v14 = vadd.f32 %v710_v11, %v437_v12  ;;  %p1038_p0 = pnand %p1037_p13, %p1031_p10 }
  0x42   :  { %928 = vmatpush3.bf16.msra.mxu1 %v1162_v33 }
  0x43   :  { %114 = vadd.xlane.f32.xlu1 %v711_v10  ;;  %112 = vadd.xlane.f32.xlu0 %v710_v11  ;;  %v439_v17 = vadd.f32 %v711_v10, %v438_v14 }
  0x44   :  { %921 = vmatprep.subr.bf16.mxu1 %v1167_v36 }
  0x45   :  { %v440_v18 = vadd.f32 %v714_v16, %v439_v17  ;;  %v101_v17 = vld [vmem:[#allocation7 + $0x28] sm:$0xff] }
  0x46   :  { %929 = vmatpush3.bf16.msra.mxu1 %v1167_v36 }
  0x47   :  { %118 = vadd.xlane.f32.xlu1 %v715_v15  ;;  %116 = vadd.xlane.f32.xlu0 %v714_v16  ;;  %v441_v19 = vadd.f32 %v715_v15, %v440_v18 }
  0x48   :  { %922 = vmatprep.subr.bf16.mxu1 %v1171_v39 }
  0x49   :  { %v442_v20 = vrot.slane %v441_v19, 4 }
  0x4a   :  { %930 = vmatpush3.bf16.msra.mxu1 %v1171_v39 }
  0x4b   :  { %v443_v21 = vadd.f32 %v442_v20, %v441_v19  ;;  %923 = vmatprep.subr.bf16.mxu1 %v1175_v42 }
  0x4d   :  { %v444_v22 = vrot.slane %v443_v21, 2 }
  0x4e   :  { %931 = vmatpush3.bf16.msra.mxu1 %v1175_v42 }
  0x4f   :  { %v445_v23 = vadd.f32 %v444_v22, %v443_v21  ;;  %924 = vmatprep.subr.bf16.mxu1 %v1179_v45 }
  0x51   :  { %v446_v24 = vrot.slane %v445_v23, 1 }
  0x52   :  { %932 = vmatpush3.bf16.msra.mxu1 %v1179_v45 }
  0x53   :  { %v447_v26 = vadd.f32 %v446_v24, %v445_v23  ;;  %925 = vmatprep.subr.bf16.mxu1 %v1183_v50 }
  0x55   :  { %v448_v27 = vadd.f32 %v447_v26, %v434_v25  ;;  %v102_v26 = vld [vmem:[#allocation7 + $0x30] sm:$0xff] }
  0x56   :  { %933 = vmatpush3.bf16.msra.mxu1 %v1183_v50 }
  0x57   :  { %449 = vst [vmem:[#allocation3] sm:$0x1] %v448_v27  ;;  %926 = vmatprep.subr.bf16.mxu1 %v1187_v55  ;;  %v103_v27 = vld [vmem:[#allocation7 + $0x38] sm:$0xff] }
  0x5a   :  { %934 = vmatpush3.bf16.msra.mxu1 %v1187_v55 }
  0x74   :  { %176 = vxpose.xlu0.b32.start [1/8] (short) %v702_v4, 128  ;;  %v99_v4 = vld [vmem:[#allocation7 + $0x18] sm:$0xff] }
  0x78   :  { %177 = vxpose.xlu0.b32.cont [2/8] (short) %v703_v5, 128  ;;  %v96_v5 = vld [vmem:[#allocation7] sm:$0xff] }
  0x7c   :  { %178 = vxpose.xlu0.b32.cont [3/8] (short) %v706_v3, 128 }
  0x80   :  { %179 = vxpose.xlu0.b32.cont [4/8] (short) %v707_v6, 128  ;;  %v97_v6 = vld [vmem:[#allocation7 + $0x8] sm:$0xff] }
  0x84   :  { %180 = vxpose.xlu0.b32.cont [5/8] (short) %v710_v11, 128 }
  0x88   :  { %181 = vxpose.xlu0.b32.cont [6/8] (short) %v711_v10, 128 }
  0x8c   :  { %182 = vxpose.xlu0.b32.cont [7/8] (short) %v714_v16, 128  ;;  %v100_v16 = vld [vmem:[#allocation7 + $0x20] sm:$0xff] }
  0x90   :  { %183 = vxpose.xlu0.b32.end [8/8] (short) %v715_v15, 128 }
  0xc8   :  { %v109_v48 = vpop.xlane.xlu1 %108  ;;  %v105_v49 = vpop.xlane.xlu0 %104 }
  0xc9   :  { %946 = vrsqrt.f32 %v109_v48 }
  0xca   :  { %948 = vrsqrt.f32 %v105_v49 }
  0xcc   :  { %v111_v53 = vpop.xlane.xlu1 %110  ;;  %v107_v54 = vpop.xlane.xlu0 %106 }
  0xcd   :  { %950 = vrsqrt.f32 %v111_v53 }
  0xce   :  { %952 = vrsqrt.f32 %v107_v54 }
  0xd0   :  { %v115_v56 = vpop.xlane.xlu1 %114  ;;  %v113_v57 = vpop.xlane.xlu0 %112 }
  0xd1   :  { %954 = vrsqrt.f32 %v115_v56 }
  0xd2   :  { %956 = vrsqrt.f32 %v113_v57 }
  0xd3   :  { %v947_v58 = vpop.eup %946 }
  0xd4   :  { %v949_v59 = vpop.eup %948  ;;  %v119_v60 = vpop.xlane.xlu1 %118  ;;  %vm130_vm0 = vweird.f32 %v947_v58 }
  0xd5   :  { %v117_v61 = vpop.xlane.xlu0 %116  ;;  %958 = vrsqrt.f32 %v119_v60  ;;  %vm128_vm1 = vweird.f32 %v949_v59  ;;  %vm1193_vm3 = vmxor %vm130_vm0, %vm1090_vm2 }
  0xd6   :  { %960 = vrsqrt.f32 %v117_v61  ;;  %vm1198_vm4 = vmxor %vm128_vm1, %vm1090_vm2  ;;  %v146_v2 = vsel %vm1193_vm3, %v947_v58, 0.0  ;;  %vm208_vm1 = vcmask 523264  }
  0xd7   :  { %v951_v0 = vpop.eup %950  ;;  %v144_v7 = vsel %vm1198_vm4, %v949_v59, 0.0  ;;  %v154_v9 = vmul.f32 %v146_v2, %v98_v1  ;;  %v646_v2 = vld [vmem:[#allocation3] sm:$0x1] }
  0xd8   :  { %v953_v3 = vpop.eup %952  ;;  %vm131_vm5 = vweird.f32 %v951_v0  ;;  %v152_v14 = vmul.f32 %v144_v7, %v96_v5  ;;  %962 = vrcp.f32 %v646_v2 }
  0xd9   :  { %vm129_vm6 = vweird.f32 %v953_v3  ;;  %vm139_vm7 = vmxor %vm131_vm5, %vm1090_vm2 }
  0xda   :  { %vm137_vm8 = vmxor %vm129_vm6, %vm1090_vm2  ;;  %v147_v8 = vsel %vm139_vm7, %v951_v0, 0.0 }
  0xdb   :  { %v955_v10 = vpop.eup %954  ;;  %v145_v11 = vsel %vm137_vm8, %v953_v3, 0.0  ;;  %v155_v12 = vmul.f32 %v147_v8, %v99_v4 }
  0xdc   :  { %v957_v13 = vpop.eup %956  ;;  %v153_v15 = vmul.f32 %v145_v11, %v97_v6  ;;  %vm133_vm9 = vweird.f32 %v955_v10 }
  0xdd   :  { %vm132_vm10 = vweird.f32 %v957_v13  ;;  %vm141_vm11 = vmxor %vm133_vm9, %vm1090_vm2  ;;  %v875_v19 = vpack.c.bf16 %v155_v12, %v154_v9 }
  0xde   :  { %v871_v18 = vpack.c.bf16 %v153_v15, %v152_v14  ;;  %vm140_vm12 = vmxor %vm132_vm10, %vm1090_vm2  ;;  %v149_v20 = vsel %vm141_vm11, %v955_v10, 0.0 }
  0xdf   :  { %v959_v21 = vpop.eup %958  ;;  %v148_v22 = vsel %vm140_vm12, %v957_v13, 0.0  ;;  %v157_v25 = vmul.f32 %v149_v20, %v101_v17 }
  0xe0   :  { %v961_v23 = vpop.eup %960  ;;  %872 = vmatprep.subr.bf16.mxu0 %v871_v18  ;;  %v156_v24 = vmul.f32 %v148_v22, %v100_v16  ;;  %vm135_vm13 = vweird.f32 %v959_v21 }
  0xe1   :  { %874 = vmatpush3.bf16.msra.mxu0 %v871_v18  ;;  %vm134_vm14 = vweird.f32 %v961_v23  ;;  %vm143_vm15 = vmxor %vm135_vm13, %vm1090_vm2 }
  0xe2   :  { %876 = vmatprep.subr.bf16.mxu0 %v875_v19  ;;  %vm142_vm0 = vmxor %vm134_vm14, %vm1090_vm2  ;;  %v151_v28 = vsel %vm143_vm15, %v959_v21, 0.0  ;;  %v879_v30 = vpack.c.bf16 %v157_v25, %v156_v24  ;;  %v963_v3 = vpop.eup %962 }
  0xe3   :  { %v150_v29 = vsel %vm142_vm0, %v961_v23, 0.0  ;;  %v159_v34 = vmul.f32 %v151_v28, %v103_v27  ;;  %vm648_vm3 = vweird.f32 %v963_v3 }
  0xe4   :  { %v158_v32 = vmul.f32 %v150_v29, %v102_v26  ;;  %vm649_vm4 = vmxor %vm648_vm3, %vm1090_vm2 }
  0xe5   :  { %878 = vmatpush3.bf16.msra.mxu0 %v875_v19  ;;  %v650_v4 = vsel %vm649_vm4, %v963_v3, 0.0 }
  0xe6   :  { %880 = vmatprep.subr.bf16.mxu0 %v879_v30  ;;  %v883_v35 = vpack.c.bf16 %v159_v34, %v158_v32  ;;  %651 = vst [vmem:[#allocation11] sm:$0x1] %v650_v4 }
  0xe9   :  { %882 = vmatpush3.bf16.msra.mxu0 %v879_v30 }
  0xea   :  { %884 = vmatprep.subr.bf16.mxu0 %v883_v35 }
  0xed   :  { %886 = vmatpush3.bf16.msra.mxu0 %v883_v35 }
  0xee   :  { %888 = vmatprep.subr.bf16.mxu0 %v1160_v31 }
  0xf4   :  { %v192_v37 = vpop.trf.xlu0 }
  0xf5   :  { %791 = vmatprep.mubr.msk.f32.mxu0 %vm208_vm1, %v192_v37 }
  0xf8   :  { %v193_v38 = vpop.trf.xlu0 }
  0xf9   :  { %792 = vmatmul.mubr.msk.f32.vlgmr.msra.gmra.mrb[0].mxu0 %vm208_vm1, %v193_v38 }
  0xfa   :  { %890 = vmatpush3.bf16.msra.mxu0 %v1160_v31 }
  0xfb   :  { %892 = vmatprep.subr.bf16.mxu0 %v1162_v33 }
  0xfc   :  { %v194_v40 = vpop.trf.xlu0 }
  0xfd   :  { %794 = vmatprep.mubr.msk.f32.mxu0 %vm208_vm1, %v194_v40 }
  0xfe   :  { %894 = vmatpush3.bf16.msra.mxu0 %v1162_v33 }
  0xff   :  { %896 = vmatprep.subr.bf16.mxu0 %v1167_v36 }
 0x100   :  { %v195_v41 = vpop.trf.xlu0 }
 0x101   :  { %795 = vmatmul.mubr.msk.f32.gmra.mrb[2].mxu0 %vm208_vm1, %v195_v41 }
 0x102   :  { %898 = vmatpush3.bf16.msra.mxu0 %v1167_v36 }
 0x103   :  { %900 = vmatprep.subr.bf16.mxu0 %v1171_v39 }
 0x104   :  { %v196_v43 = vpop.trf.xlu0 }
 0x105   :  { %797 = vmatprep.mubr.msk.f32.mxu0 %vm208_vm1, %v196_v43 }
 0x106   :  { %902 = vmatpush3.bf16.msra.mxu0 %v1171_v39 }
 0x107   :  { %904 = vmatprep.subr.bf16.mxu0 %v1175_v42 }
 0x108   :  { %v197_v31 = vpop.trf.xlu0 }
 0x109   :  { %798 = vmatmul.mubr.msk.f32.gmra.mrb[4].mxu0 %vm208_vm1, %v197_v31 }
 0x10a   :  { %906 = vmatpush3.bf16.msra.mxu0 %v1175_v42 }
 0x10b   :  { %908 = vmatprep.subr.bf16.mxu0 %v1179_v45 }
 0x10c   :  { %v198_v33 = vpop.trf.xlu0 }
 0x10d   :  { %800 = vmatprep.mubr.msk.f32.mxu0 %vm208_vm1, %v198_v33 }
 0x10e   :  { %910 = vmatpush3.bf16.msra.mxu0 %v1179_v45 }
 0x10f   :  { %912 = vmatprep.subr.bf16.mxu0 %v1183_v50 }
 0x110   :  { %v199_v36 = vpop.trf.xlu0 }
 0x111   :  { %801 = vmatmul.mubr.msk.f32.gmra.mrb[6].mxu0 %vm208_vm1, %v199_v36 }
 0x112   :  { %914 = vmatpush3.bf16.msra.mxu0 %v1183_v50 }
 0x113   :  { %916 = vmatprep.subr.bf16.mxu0 %v1187_v55 }
 0x114   :  { %v200_v39 = vpop.trf.xlu0 }
 0x115   :  { %803 = vmatprep.mubr.msk.f32.mxu0 %vm208_vm1, %v200_v39 }
 0x116   :  { %918 = vmatpush3.bf16.msra.mxu0 %v1187_v55 }
 0x118   :  { %v201_v42 = vpop.trf.xlu0 }
 0x119   :  { %804 = vmatmul.mubr.msk.f32.gmra.mrb[8].mxu0 %vm208_vm1, %v201_v42 }
 0x11c   :  { %v202_v44 = vpop.trf.xlu0 }
 0x11d   :  { %806 = vmatprep.mubr.msk.f32.mxu0 %vm208_vm1, %v202_v44 }
 0x120   :  { %v203_v45 = vpop.trf.xlu0 }
 0x121   :  { %807 = vmatmul.mubr.msk.f32.gmra.mrb[10].mxu0 %vm208_vm1, %v203_v45 }
 0x124   :  { %v204_v46 = vpop.trf.xlu0 }
 0x125   :  { %809 = vmatprep.mubr.msk.f32.mxu0 %vm208_vm1, %v204_v46 }
 0x128   :  { %v205_v47 = vpop.trf.xlu0 }
 0x129   :  { %810 = vmatmul.mubr.msk.f32.gmra.mrb[12].mxu0 %vm208_vm1, %v205_v47 }
 0x12c   :  { %v206_v48 = vpop.trf.xlu0 }
 0x12d   :  { %812 = vmatprep.mubr.msk.f32.mxu0 %vm208_vm1, %v206_v48 }
 0x130   :  { %v207_v49 = vpop.trf.xlu0 }
 0x131   :  { %813 = vmatmul.mubr.msk.f32.gmra.mrb[14].mxu0 %vm208_vm1, %v207_v49 }
 0x1cc   :  { %v793_v50 = vpop.f32.mrb[0].mxu0 }
 0x1cd   :  { %v323_v51 = vpop.f32.mrb[1].mxu0 }
 0x1ce   :  { %847 = vmatprep.mubr.f32.mxu0 %v323_v51 }
 0x1cf   :  { %848 = vmatmul.mubr.f32.vlgmr.msra.gmra.mrb[16].mxu0 %v793_v50 }
 0x1d4   :  { %v796_v52 = vpop.f32.mrb[2].mxu0 }
 0x1d5   :  { %v333_v53 = vpop.f32.mrb[3].mxu0 }
 0x1d6   :  { %850 = vmatprep.mubr.f32.mxu0 %v333_v53 }
 0x1d7   :  { %851 = vmatmul.mubr.f32.gmra.mrb[18].mxu0 %v796_v52 }
 0x1dc   :  { %v799_v54 = vpop.f32.mrb[4].mxu0 }
 0x1dd   :  { %v343_v55 = vpop.f32.mrb[5].mxu0 }
 0x1de   :  { %853 = vmatprep.mubr.f32.mxu1 %v343_v55 }
 0x1df   :  { %854 = vmatmul.mubr.f32.vlgmr.msra.gmra.mrb[0].mxu1 %v799_v54 }
 0x1e4   :  { %v802_v56 = vpop.f32.mrb[6].mxu0 }
 0x1e5   :  { %v353_v57 = vpop.f32.mrb[7].mxu0 }
 0x1e6   :  { %856 = vmatprep.mubr.f32.mxu1 %v353_v57 }
 0x1e7   :  { %857 = vmatmul.mubr.f32.gmra.mrb[2].mxu1 %v802_v56 }
 0x1ec   :  { %v805_v58 = vpop.f32.mrb[8].mxu0 }
 0x1ed   :  { %v363_v59 = vpop.f32.mrb[9].mxu0 }
 0x1ee   :  { %859 = vmatprep.mubr.f32.mxu1 %v363_v59 }
 0x1ef   :  { %860 = vmatmul.mubr.f32.gmra.mrb[4].mxu1 %v805_v58 }
 0x1f4   :  { %v808_v60 = vpop.f32.mrb[10].mxu0 }
 0x1f5   :  { %v373_v61 = vpop.f32.mrb[11].mxu0 }
 0x1f6   :  { %862 = vmatprep.mubr.f32.mxu1 %v373_v61 }
 0x1f7   :  { %863 = vmatmul.mubr.f32.gmra.mrb[6].mxu1 %v808_v60 }
 0x1fc   :  { %v811_v62 = vpop.f32.mrb[12].mxu0 }
 0x1fd   :  { %v383_v63 = vpop.f32.mrb[13].mxu0 }
 0x1fe   :  { %865 = vmatprep.mubr.f32.mxu1 %v383_v63 }
 0x1ff   :  { %866 = vmatmul.mubr.f32.gmra.mrb[8].mxu1 %v811_v62 }
 0x204   :  { %v814_v0 = vpop.f32.mrb[14].mxu0 }
 0x205   :  { %v393_v1 = vpop.f32.mrb[15].mxu0 }
 0x206   :  { %868 = vmatprep.mubr.f32.mxu1 %v393_v1 }
 0x207   :  { %869 = vmatmul.mubr.f32.gmra.mrb[10].mxu1 %v814_v0 }
 0x208   :  { %1041 = shalt.err (!%p1038_p0)
}
 0x209   :  { %s1042_s8 = scalar_lea.hbm %s1276_s4, 16 }
 0x20a   :  { %p1043_p1 = scmp.ne.s32.totalorder %s1276_s4, %s1042_s8  ;;  %p1046_p2 = scmp.lt.u32.totalorder %s1042_s8, %s1276_s4 }
 0x20c   :  { %p1048_p3 = pnand %p1046_p2, %p1043_p1 }
 0x20e   :  { %1051 = shalt.err (!%p1048_p3)
}
 0x20f   :  { %673 = dma.vmem_to_hbm [thread:$0]  %s671_s29, 16, %s1276_s4, [#allocation12]  }
 0x210   :  { %s1092_s4 = smov [#allocation10]  }
 0x211   :  { %s657_s14 = sshll.u32 %s1092_s4, 4  ;;  %s658_s14 = int_to_ptr.vmem [resolvable:$true] %s657_s14 }
 0x212   :  { %s1052_s15 = scalar_lea.vmem %s658_s14, 2048  ;;  %p1057_p5 = scmp.lt.s32.totalorder %s658_s14, %s658_s14 }
 0x213   :  { %p1053_p4 = scmp.ne.s32.totalorder %s658_s14, %s1052_s15  ;;  %p1058_p6 = scmp.lt.s32.totalorder %s1052_s15, %s1052_s15 }
 0x215   :  { %p1059_p7 = por %p1058_p6, %p1057_p5 }
 0x217   :  { %p1060_p8 = pnand %p1059_p7, %p1053_p4 }
 0x2a2   :  { %v849_v5 = vpop.f32.mrb[16].mxu0 }
 0x2a3   :  { %631 = vst [vmem:[#allocation10 + $0x8] sm:$0xff] %v849_v5  ;;  %v551_v6 = vpop.f32.mrb[17].mxu0 }
 0x2a4   :  { %630 = vst [vmem:[#allocation10] sm:$0xff] %v551_v6 }
 0x2aa   :  { %v852_v7 = vpop.f32.mrb[18].mxu0 }
 0x2ab   :  { %633 = vst [vmem:[#allocation10 + $0x18] sm:$0xff] %v852_v7  ;;  %v561_v8 = vpop.f32.mrb[19].mxu0 }
 0x2ac   :  { %632 = vst [vmem:[#allocation10 + $0x10] sm:$0xff] %v561_v8 }
 0x2b2   :  { %v855_v9 = vpop.f32.mrb[0].mxu1 }
 0x2b3   :  { %635 = vst [vmem:[#allocation10 + $0x28] sm:$0xff] %v855_v9  ;;  %v571_v10 = vpop.f32.mrb[1].mxu1 }
 0x2b4   :  { %634 = vst [vmem:[#allocation10 + $0x20] sm:$0xff] %v571_v10 }
 0x2ba   :  { %v858_v11 = vpop.f32.mrb[2].mxu1 }
 0x2bb   :  { %637 = vst [vmem:[#allocation10 + $0x38] sm:$0xff] %v858_v11  ;;  %v581_v12 = vpop.f32.mrb[3].mxu1 }
 0x2bc   :  { %636 = vst [vmem:[#allocation10 + $0x30] sm:$0xff] %v581_v12 }
 0x2c2   :  { %v861_v13 = vpop.f32.mrb[4].mxu1 }
 0x2c3   :  { %639 = vst [vmem:[#allocation10 + $0x48] sm:$0xff] %v861_v13  ;;  %v591_v14 = vpop.f32.mrb[5].mxu1 }
 0x2c4   :  { %638 = vst [vmem:[#allocation10 + $0x40] sm:$0xff] %v591_v14 }
 0x2ca   :  { %v864_v15 = vpop.f32.mrb[6].mxu1 }
 0x2cb   :  { %641 = vst [vmem:[#allocation10 + $0x58] sm:$0xff] %v864_v15  ;;  %v601_v16 = vpop.f32.mrb[7].mxu1 }
 0x2cc   :  { %640 = vst [vmem:[#allocation10 + $0x50] sm:$0xff] %v601_v16 }
 0x2d2   :  { %v867_v17 = vpop.f32.mrb[8].mxu1 }
 0x2d3   :  { %643 = vst [vmem:[#allocation10 + $0x68] sm:$0xff] %v867_v17  ;;  %v611_v18 = vpop.f32.mrb[9].mxu1 }
 0x2d4   :  { %642 = vst [vmem:[#allocation10 + $0x60] sm:$0xff] %v611_v18 }
 0x2da   :  { %v870_v19 = vpop.f32.mrb[10].mxu1 }
 0x2db   :  { %645 = vst [vmem:[#allocation10 + $0x78] sm:$0xff] %v870_v19  ;;  %v621_v20 = vpop.f32.mrb[11].mxu1 }
 0x2dc   :  { %644 = vst [vmem:[#allocation10 + $0x70] sm:$0xff] %v621_v20 }
 0x2dd   :  { %1063 = shalt.err (!%p1060_p8)
}
 0x2de   :  { %s1064_s18 = scalar_lea.hbm %s1275_s3, 2048 }
 0x2df   :  { %p1065_p9 = scmp.ne.s32.totalorder %s1275_s3, %s1064_s18  ;;  %p1068_p10 = scmp.lt.u32.totalorder %s1064_s18, %s1275_s3 }
 0x2e1   :  { %p1070_p11 = pnand %p1068_p10, %p1065_p9 }
 0x2e3   :  { %1073 = shalt.err (!%p1070_p11)
}
 0x2e4   :  { %663 = dma.vmem_to_hbm [thread:$0]  %s658_s14, 2048, %s1275_s3, [#allocation6], %s1083_s25, %s1083_s25, %s1084_s26  }
 0x2e5   :  { %1078 = dma.done.wait [#allocation6], 2048  }
 0x2e6   :  { %1079 = vsyncadd [#allocation6], 4294965248 }
 0x2e7   :  { %1080 = dma.done.wait [#allocation12], 16  }
 0x2e8   :  { %1081 = vsyncadd [#allocation12], 4294967280 }
 0x2e9   :  { %680 = vsyncpa [#allocation5], 1 }
 0x2ea   :  { %681 = vsyncpa [#allocation8], 1 }
 0x2eb   :  { %682 = vsyncpa [#allocation6], 1 }
 0x2ec   :  { %683 = vsyncpa [#allocation12], 1 }

</bundles_post_ra>
